<compile_context>
chip_gen: v5e
topology: v5e:2x2
jax: 0.10.0
libtpu: 0.0.40
codegen_flags: <defaults>
</compile_context>

<pallas_src>
import functools

import jax
import jax.numpy as jnp
from jax.experimental import pallas as pl
from jax.experimental.pallas import tpu as pltpu


# --------------------------------------------------------------------------
# Kernel: one grid step = one (batch, roi-tile) XYWH delta2bbox decode.
# --------------------------------------------------------------------------
def _box_decode_kernel(geom_ref, box_ref, *, legacy_bbox, im_hw):
    """geom_ref: (8, TN) rows [x1, y1, x2, y2, dx, dy, dw, dh]
       box_ref : (4, TN) rows [x1, y1, x2, y2] (decoded)."""
    offset = 1.0 if legacy_bbox else 0.0
    f32 = jnp.float32

    # Upcast in vregs (input DMA stays at the head's native width).
    x1 = geom_ref[0:1, :].astype(f32)
    y1 = geom_ref[1:2, :].astype(f32)
    x2 = geom_ref[2:3, :].astype(f32)
    y2 = geom_ref[3:4, :].astype(f32)
    dx = geom_ref[4:5, :].astype(f32)
    dy = geom_ref[5:6, :].astype(f32)
    dw = geom_ref[6:7, :].astype(f32)
    dh = geom_ref[7:8, :].astype(f32)

    # delta2bbox (XYWH) decode on the VPU/EUP.
    pw = x2 - x1 + offset
    ph = y2 - y1 + offset
    px = x1 + 0.5 * pw
    py = y1 + 0.5 * ph

    gw = pw * jnp.exp(dw)
    gh = ph * jnp.exp(dh)
    gx = px + pw * dx
    gy = py + ph * dy

    nx1 = gx - 0.5 * gw
    ny1 = gy - 0.5 * gh
    nx2 = gx + 0.5 * gw - offset
    ny2 = gy + 0.5 * gh - offset

    if im_hw is not None:
        im_h, im_w = im_hw
        nx1 = jnp.clip(nx1, 0.0, im_w - offset)
        nx2 = jnp.clip(nx2, 0.0, im_w - offset)
        ny1 = jnp.clip(ny1, 0.0, im_h - offset)
        ny2 = jnp.clip(ny2, 0.0, im_h - offset)

    odt = box_ref.dtype
    box_ref[0:1, :] = nx1.astype(odt)
    box_ref[1:2, :] = ny1.astype(odt)
    box_ref[2:3, :] = nx2.astype(odt)
    box_ref[3:4, :] = ny2.astype(odt)


# --------------------------------------------------------------------------
# Wrapper
# --------------------------------------------------------------------------
def _round_up(x, m):
    return (x + m - 1) // m * m


def _choose_tile_n(n, batch, max_tile_n):
    """Lane tile (multiple of 128): <= max_tile_n (vreg pressure / v5e spill
    avoidance) and, for B == 1, small enough to give >= 2 grid steps so v7x
    megacore sharding can engage."""
    tn = min(_round_up(n, 128), max(128, _round_up(max_tile_n, 128)))
    if batch == 1:
        tn = min(tn, max(128, _round_up(pl.cdiv(n, 2), 128)))
    return tn


def compact_to_aos(boxes_soa, scores):
    """Compact outputs -> original (B, N*C, 6) AoS layout
    [x1, y1, x2, y2, score, 1-based cls_idx] (compat / testing path).

    NOTE: this materializes the fully replicated tensor in HBM; only use it
    when a consumer really needs the original ordering.
    """
    b, _, n = boxes_soa.shape
    c = scores.shape[-1]
    boxes_n4 = jnp.transpose(boxes_soa, (0, 2, 1)).astype(jnp.float32)  # (B, N, 4)
    boxes_rep = jnp.broadcast_to(boxes_n4[:, :, None, :], (b, n, c, 4))
    cls_idx = jnp.broadcast_to(
        (jnp.arange(c, dtype=jnp.float32) + 1.0)[None, None, :, None],
        (b, n, c, 1))
    out = jnp.concatenate(
        [boxes_rep, scores.astype(jnp.float32)[..., None], cls_idx], axis=-1)
    return out.reshape(b, n * c, 6)


def rcnn_decoder_forward(batch_rois, rcnn_cls_pred, rcnn_reg_pred, *,
                         cls_act_type="sigmoid", legacy_bbox=False,
                         im_hw=None, boxes_dtype=jnp.float32,
                         max_tile_n=512, aos_output=False):
    """batch_rois: (B, N, 4); rcnn_cls_pred: (B*N, C_cls, 1, 1);
    rcnn_reg_pred: (B*N, 4, 1, 1).

    Default (compact) return:
      pred_boxes  : (B, 4, N)  decoded [x1, y1, x2, y2], roi axis on lanes
      pred_scores : (B, N, C)  per-class scores (background dropped for softmax)
      pred_cls_idx: (C,)       1-based class indices (constant; not replicated)
    aos_output=True instead returns pred_boxes with the original (B, N*C, 6)
    ordering (costs an extra replicated HBM pass).
    """
    if cls_act_type in ("sigmoid", "identity"):
        index_start = 0
    elif cls_act_type == "softmax":
        index_start = 1
    else:
        raise NotImplementedError(cls_act_type)

    B, N, _ = batch_rois.shape
    assert rcnn_cls_pred.shape[0] == B * N
    assert rcnn_reg_pred.shape[0] == B * N

    # Glue: replicate `.split(split_size)` + stack + [:, :, :, 0, 0] slicing.
    cls = rcnn_cls_pred[:, :, 0, 0].reshape(B, N, -1)[..., index_start:]  # (B, N, C)
    reg = rcnn_reg_pred[:, :, 0, 0].reshape(B, N, 4)                      # (B, N, 4)
    C = cls.shape[-1]

    # Pack rois + deltas into one (B, 8, N) channel-first tensor: a single
    # aligned full-sublane DMA per grid step.
    geom_dtype = jnp.promote_types(batch_rois.dtype, reg.dtype)
    geom_t = jnp.transpose(
        jnp.concatenate(
            [batch_rois.astype(geom_dtype), reg.astype(geom_dtype)], axis=-1),
        (0, 2, 1))                                                        # (B, 8, N)

    TN = _choose_tile_n(N, B, max_tile_n)
    n_tiles = pl.cdiv(N, TN)   # partial last block handled by Pallas masking

    kernel = functools.partial(
        _box_decode_kernel, legacy_bbox=legacy_bbox, im_hw=im_hw)

    boxes = pl.pallas_call(
        kernel,
        out_shape=jax.ShapeDtypeStruct((B, 4, N), boxes_dtype),
        grid=(B, n_tiles),
        in_specs=[pl.BlockSpec((None, 8, TN), lambda b, t: (b, 0, t))],
        out_specs=pl.BlockSpec((None, 4, TN), lambda b, t: (b, 0, t)),
        compiler_params=pltpu.CompilerParams(
            dimension_semantics=("parallel", "parallel")),
    )(geom_t)

    if aos_output:
        return {"pred_boxes": compact_to_aos(boxes, cls), "num_rois": N}
    return {
        "pred_boxes": boxes,
        "pred_scores": cls,
        "pred_cls_idx": jnp.arange(1, C + 1, dtype=jnp.float32),
        "num_rois": N,
    }


# --------------------------------------------------------------------------
# Pure-JAX reference (for correctness check)
# --------------------------------------------------------------------------
def _reference_forward(batch_rois, rcnn_cls_pred, rcnn_reg_pred, *,
                       cls_act_type="sigmoid", legacy_bbox=False, im_hw=None):
    index_start = 0 if cls_act_type in ("sigmoid", "identity") else 1
    B, N, _ = batch_rois.shape
    cls = rcnn_cls_pred[:, :, 0, 0].reshape(B, N, -1)[..., index_start:]
    reg = rcnn_reg_pred[:, :, 0, 0].reshape(B, N, 4)
    C = cls.shape[-1]
    off = 1.0 if legacy_bbox else 0.0

    rois = batch_rois.astype(jnp.float32)
    reg = reg.astype(jnp.float32)
    x1, y1, x2, y2 = [rois[..., i] for i in range(4)]
    dx, dy, dw, dh = [reg[..., i] for i in range(4)]
    pw = x2 - x1 + off
    ph = y2 - y1 + off
    px = x1 + 0.5 * pw
    py = y1 + 0.5 * ph
    gw = pw * jnp.exp(dw)
    gh = ph * jnp.exp(dh)
    gx = px + pw * dx
    gy = py + ph * dy
    nx1 = gx - 0.5 * gw
    ny1 = gy - 0.5 * gh
    nx2 = gx + 0.5 * gw - off
    ny2 = gy + 0.5 * gh - off
    if im_hw is not None:
        im_h, im_w = im_hw
        nx1 = jnp.clip(nx1, 0.0, im_w - off)
        nx2 = jnp.clip(nx2, 0.0, im_w - off)
        ny1 = jnp.clip(ny1, 0.0, im_h - off)
        ny2 = jnp.clip(ny2, 0.0, im_h - off)
    boxes = jnp.stack([nx1, ny1, nx2, ny2], axis=-1)                  # (B, N, 4)
    boxes_rep = jnp.broadcast_to(boxes[:, :, None, :], (B, N, C, 4))
    cls_idx = jnp.broadcast_to(
        (jnp.arange(C, dtype=jnp.float32) + 1.0)[None, None, :, None],
        (B, N, C, 1))
    out = jnp.concatenate(
        [boxes_rep, cls.astype(jnp.float32)[..., None], cls_idx], axis=-1)
    return out.reshape(B, N * C, 6)


# --------------------------------------------------------------------------
# Self-test
# --------------------------------------------------------------------------
if __name__ == "__main__":
    key = jax.random.PRNGKey(0)

    # ---- test 1: sigmoid head, im_hw clipping, single (partial) roi tile ---
    B, N, C_CLS = 2, 8, 4
    k1, k2, k3, k4, k5, k6, k7, k8 = jax.random.split(key, 8)
    xy1 = jax.random.uniform(k1, (B, N, 2), minval=0.0, maxval=40.0)
    wh = jax.random.uniform(k2, (B, N, 2), minval=2.0, maxval=20.0)
    batch_rois = jnp.concatenate([xy1, xy1 + wh], axis=-1).astype(jnp.float32)
    rcnn_cls_pred = jax.random.uniform(k3, (B * N, C_CLS, 1, 1), dtype=jnp.float32)
    rcnn_reg_pred = jax.random.normal(k4, (B * N, 4, 1, 1), dtype=jnp.float32) * 0.2

    res = rcnn_decoder_forward(
        batch_rois, rcnn_cls_pred, rcnn_reg_pred,
        cls_act_type="sigmoid", legacy_bbox=False, im_hw=(64, 64))
    boxes = jax.block_until_ready(res["pred_boxes"])
    assert boxes.shape == (B, 4, N), boxes.shape
    assert res["pred_scores"].shape == (B, N, C_CLS), res["pred_scores"].shape

    pred = compact_to_aos(boxes, res["pred_scores"])          # compat repack
    ref = _reference_forward(
        batch_rois, rcnn_cls_pred, rcnn_reg_pred,
        cls_act_type="sigmoid", legacy_bbox=False, im_hw=(64, 64))
    assert pred.shape == (B, N * C_CLS, 6), pred.shape
    assert jnp.allclose(pred, ref, atol=1e-3, rtol=1e-4), "test1 mismatch vs reference"

    # ---- test 2: softmax head (drops bg col), legacy bbox, no clipping,
    #              B=1 so TN is capped -> 2 roi tiles, ragged last block ------
    B2, N2, C_CLS2 = 1, 200, 5
    xy1b = jax.random.uniform(k5, (B2, N2, 2), minval=0.0, maxval=100.0)
    whb = jax.random.uniform(k6, (B2, N2, 2), minval=2.0, maxval=30.0)
    batch_rois2 = jnp.concatenate([xy1b, xy1b + whb], axis=-1).astype(jnp.float32)
    rcnn_cls_pred2 = jax.random.uniform(k7, (B2 * N2, C_CLS2, 1, 1), dtype=jnp.float32)
    rcnn_reg_pred2 = jax.random.normal(k8, (B2 * N2, 4, 1, 1), dtype=jnp.float32) * 0.1

    res2 = rcnn_decoder_forward(
        batch_rois2, rcnn_cls_pred2, rcnn_reg_pred2,
        cls_act_type="softmax", legacy_bbox=True, im_hw=None, aos_output=True)
    pred2 = jax.block_until_ready(res2["pred_boxes"])
    ref2 = _reference_forward(
        batch_rois2, rcnn_cls_pred2, rcnn_reg_pred2,
        cls_act_type="softmax", legacy_bbox=True, im_hw=None)
    assert pred2.shape == (B2, N2 * (C_CLS2 - 1), 6), pred2.shape
    assert jnp.allclose(pred2, ref2, atol=1e-3, rtol=1e-4), "test2 mismatch vs reference"

    print("KERNEL_OK")
</pallas_src>

<mosaic_0001>
module attributes {stable_mosaic.version = 11 : i64} {
  func.func @_box_decode_kernel(%arg0: i32, %arg1: i32, %arg2: memref<1x8x128xf32, #tpu.memory_space<vmem>>, %arg3: memref<1x4x128xf32, #tpu.memory_space<vmem>>) attributes {dimension_semantics = [#tpu.dimension_semantics<parallel>, #tpu.dimension_semantics<parallel>], iteration_bounds = array<i64: 2, 1>, scalar_prefetch = 0 : i64, scratch_operands = 0 : i64, tpu.core_type = #tpu.core_type<tc>, window_params = [{transform_indices = @transform_0, window_bounds = array<i64: 1, 8, 128>}, {transform_indices = @transform_1, window_bounds = array<i64: 1, 4, 128>}]} {
    %c0 = arith.constant 0 : index
    %c0_0 = arith.constant 0 : index
    %c0_1 = arith.constant 0 : index
    %0 = vector.load %arg2[%c0, %c0_0, %c0_1] : memref<1x8x128xf32, #tpu.memory_space<vmem>>, vector<1x1x128xf32>
    %1 = vector.shape_cast %0 : vector<1x1x128xf32> to vector<1x128xf32>
    %c0_2 = arith.constant 0 : index
    %c1 = arith.constant 1 : index
    %c0_3 = arith.constant 0 : index
    %2 = vector.load %arg2[%c0_2, %c1, %c0_3] : memref<1x8x128xf32, #tpu.memory_space<vmem>>, vector<1x1x128xf32>
    %3 = vector.shape_cast %2 : vector<1x1x128xf32> to vector<1x128xf32>
    %c0_4 = arith.constant 0 : index
    %c2 = arith.constant 2 : index
    %c0_5 = arith.constant 0 : index
    %4 = vector.load %arg2[%c0_4, %c2, %c0_5] : memref<1x8x128xf32, #tpu.memory_space<vmem>>, vector<1x1x128xf32>
    %5 = vector.shape_cast %4 : vector<1x1x128xf32> to vector<1x128xf32>
    %c0_6 = arith.constant 0 : index
    %c3 = arith.constant 3 : index
    %c0_7 = arith.constant 0 : index
    %6 = vector.load %arg2[%c0_6, %c3, %c0_7] : memref<1x8x128xf32, #tpu.memory_space<vmem>>, vector<1x1x128xf32>
    %7 = vector.shape_cast %6 : vector<1x1x128xf32> to vector<1x128xf32>
    %c0_8 = arith.constant 0 : index
    %c4 = arith.constant 4 : index
    %c0_9 = arith.constant 0 : index
    %8 = vector.load %arg2[%c0_8, %c4, %c0_9] : memref<1x8x128xf32, #tpu.memory_space<vmem>>, vector<1x1x128xf32>
    %9 = vector.shape_cast %8 : vector<1x1x128xf32> to vector<1x128xf32>
    %c0_10 = arith.constant 0 : index
    %c5 = arith.constant 5 : index
    %c0_11 = arith.constant 0 : index
    %10 = vector.load %arg2[%c0_10, %c5, %c0_11] : memref<1x8x128xf32, #tpu.memory_space<vmem>>, vector<1x1x128xf32>
    %11 = vector.shape_cast %10 : vector<1x1x128xf32> to vector<1x128xf32>
    %c0_12 = arith.constant 0 : index
    %c6 = arith.constant 6 : index
    %c0_13 = arith.constant 0 : index
    %12 = vector.load %arg2[%c0_12, %c6, %c0_13] : memref<1x8x128xf32, #tpu.memory_space<vmem>>, vector<1x1x128xf32>
    %13 = vector.shape_cast %12 : vector<1x1x128xf32> to vector<1x128xf32>
    %c0_14 = arith.constant 0 : index
    %c7 = arith.constant 7 : index
    %c0_15 = arith.constant 0 : index
    %14 = vector.load %arg2[%c0_14, %c7, %c0_15] : memref<1x8x128xf32, #tpu.memory_space<vmem>>, vector<1x1x128xf32>
    %15 = vector.shape_cast %14 : vector<1x1x128xf32> to vector<1x128xf32>
    %16 = arith.subf %5, %1 : vector<1x128xf32>
    %cst = arith.constant 0.000000e+00 : f32
    %17 = vector.broadcast %cst : f32 to vector<1x128xf32>
    %18 = arith.addf %16, %17 : vector<1x128xf32>
    %19 = arith.subf %7, %3 : vector<1x128xf32>
    %cst_16 = arith.constant 0.000000e+00 : f32
    %20 = vector.broadcast %cst_16 : f32 to vector<1x128xf32>
    %21 = arith.addf %19, %20 : vector<1x128xf32>
    %cst_17 = arith.constant 5.000000e-01 : f32
    %22 = vector.broadcast %cst_17 : f32 to vector<1x128xf32>
    %23 = arith.mulf %22, %18 : vector<1x128xf32>
    %24 = arith.addf %1, %23 : vector<1x128xf32>
    %cst_18 = arith.constant 5.000000e-01 : f32
    %25 = vector.broadcast %cst_18 : f32 to vector<1x128xf32>
    %26 = arith.mulf %25, %21 : vector<1x128xf32>
    %27 = arith.addf %3, %26 : vector<1x128xf32>
    %28 = math.exp %13 : vector<1x128xf32>
    %29 = arith.mulf %18, %28 : vector<1x128xf32>
    %30 = math.exp %15 : vector<1x128xf32>
    %31 = arith.mulf %21, %30 : vector<1x128xf32>
    %32 = arith.mulf %18, %9 : vector<1x128xf32>
    %33 = arith.addf %24, %32 : vector<1x128xf32>
    %34 = arith.mulf %21, %11 : vector<1x128xf32>
    %35 = arith.addf %27, %34 : vector<1x128xf32>
    %cst_19 = arith.constant 5.000000e-01 : f32
    %36 = vector.broadcast %cst_19 : f32 to vector<1x128xf32>
    %37 = arith.mulf %36, %29 : vector<1x128xf32>
    %38 = arith.subf %33, %37 : vector<1x128xf32>
    %cst_20 = arith.constant 5.000000e-01 : f32
    %39 = vector.broadcast %cst_20 : f32 to vector<1x128xf32>
    %40 = arith.mulf %39, %31 : vector<1x128xf32>
    %41 = arith.subf %35, %40 : vector<1x128xf32>
    %cst_21 = arith.constant 5.000000e-01 : f32
    %42 = vector.broadcast %cst_21 : f32 to vector<1x128xf32>
    %43 = arith.mulf %42, %29 : vector<1x128xf32>
    %44 = arith.addf %33, %43 : vector<1x128xf32>
    %cst_22 = arith.constant 0.000000e+00 : f32
    %45 = vector.broadcast %cst_22 : f32 to vector<1x128xf32>
    %46 = arith.subf %44, %45 : vector<1x128xf32>
    %cst_23 = arith.constant 5.000000e-01 : f32
    %47 = vector.broadcast %cst_23 : f32 to vector<1x128xf32>
    %48 = arith.mulf %47, %31 : vector<1x128xf32>
    %49 = arith.addf %35, %48 : vector<1x128xf32>
    %cst_24 = arith.constant 0.000000e+00 : f32
    %50 = vector.broadcast %cst_24 : f32 to vector<1x128xf32>
    %51 = arith.subf %49, %50 : vector<1x128xf32>
    %cst_25 = arith.constant 0.000000e+00 : f32
    %cst_26 = arith.constant 6.400000e+01 : f32
    %52 = vector.broadcast %cst_25 : f32 to vector<1x128xf32>
    %53 = arith.maximumf %52, %38 : vector<1x128xf32>
    %54 = vector.broadcast %cst_26 : f32 to vector<1x128xf32>
    %55 = arith.minimumf %54, %53 : vector<1x128xf32>
    %cst_27 = arith.constant 0.000000e+00 : f32
    %cst_28 = arith.constant 6.400000e+01 : f32
    %56 = vector.broadcast %cst_27 : f32 to vector<1x128xf32>
    %57 = arith.maximumf %56, %46 : vector<1x128xf32>
    %58 = vector.broadcast %cst_28 : f32 to vector<1x128xf32>
    %59 = arith.minimumf %58, %57 : vector<1x128xf32>
    %cst_29 = arith.constant 0.000000e+00 : f32
    %cst_30 = arith.constant 6.400000e+01 : f32
    %60 = vector.broadcast %cst_29 : f32 to vector<1x128xf32>
    %61 = arith.maximumf %60, %41 : vector<1x128xf32>
    %62 = vector.broadcast %cst_30 : f32 to vector<1x128xf32>
    %63 = arith.minimumf %62, %61 : vector<1x128xf32>
    %cst_31 = arith.constant 0.000000e+00 : f32
    %cst_32 = arith.constant 6.400000e+01 : f32
    %64 = vector.broadcast %cst_31 : f32 to vector<1x128xf32>
    %65 = arith.maximumf %64, %51 : vector<1x128xf32>
    %66 = vector.broadcast %cst_32 : f32 to vector<1x128xf32>
    %67 = arith.minimumf %66, %65 : vector<1x128xf32>
    %c0_33 = arith.constant 0 : index
    %c0_34 = arith.constant 0 : index
    %c0_35 = arith.constant 0 : index
    %68 = vector.load %arg3[%c0_33, %c0_34, %c0_35] : memref<1x4x128xf32, #tpu.memory_space<vmem>>, vector<1x1x128xf32>
    %69 = vector.shape_cast %68 : vector<1x1x128xf32> to vector<1x128xf32>
    %70 = vector.shape_cast %55 : vector<1x128xf32> to vector<1x1x128xf32>
    tpu.vector_store %arg3[%c0_33, %c0_34, %c0_35], %70 {strides = array<i32>} : memref<1x4x128xf32, #tpu.memory_space<vmem>>, vector<1x1x128xf32>,
    %c0_36 = arith.constant 0 : index
    %c1_37 = arith.constant 1 : index
    %c0_38 = arith.constant 0 : index
    %71 = vector.load %arg3[%c0_36, %c1_37, %c0_38] : memref<1x4x128xf32, #tpu.memory_space<vmem>>, vector<1x1x128xf32>
    %72 = vector.shape_cast %71 : vector<1x1x128xf32> to vector<1x128xf32>
    %73 = vector.shape_cast %63 : vector<1x128xf32> to vector<1x1x128xf32>
    tpu.vector_store %arg3[%c0_36, %c1_37, %c0_38], %73 {strides = array<i32>} : memref<1x4x128xf32, #tpu.memory_space<vmem>>, vector<1x1x128xf32>,
    %c0_39 = arith.constant 0 : index
    %c2_40 = arith.constant 2 : index
    %c0_41 = arith.constant 0 : index
    %74 = vector.load %arg3[%c0_39, %c2_40, %c0_41] : memref<1x4x128xf32, #tpu.memory_space<vmem>>, vector<1x1x128xf32>
    %75 = vector.shape_cast %74 : vector<1x1x128xf32> to vector<1x128xf32>
    %76 = vector.shape_cast %59 : vector<1x128xf32> to vector<1x1x128xf32>
    tpu.vector_store %arg3[%c0_39, %c2_40, %c0_41], %76 {strides = array<i32>} : memref<1x4x128xf32, #tpu.memory_space<vmem>>, vector<1x1x128xf32>,
    %c0_42 = arith.constant 0 : index
    %c3_43 = arith.constant 3 : index
    %c0_44 = arith.constant 0 : index
    %77 = vector.load %arg3[%c0_42, %c3_43, %c0_44] : memref<1x4x128xf32, #tpu.memory_space<vmem>>, vector<1x1x128xf32>
    %78 = vector.shape_cast %77 : vector<1x1x128xf32> to vector<1x128xf32>
    %79 = vector.shape_cast %67 : vector<1x128xf32> to vector<1x1x128xf32>
    tpu.vector_store %arg3[%c0_42, %c3_43, %c0_44], %79 {strides = array<i32>} : memref<1x4x128xf32, #tpu.memory_space<vmem>>, vector<1x1x128xf32>,
    return
  }
  func.func @transform_0(%arg0: i32, %arg1: i32) -> (i32, i32, i32) {
    %c0_i32 = arith.constant 0 : i32
    %c0_i32_0 = arith.constant 0 : i32
    return %arg0, %c0_i32, %arg1 : i32, i32, i32
  }
  func.func @transform_1(%arg0: i32, %arg1: i32) -> (i32, i32, i32) {
    %c0_i32 = arith.constant 0 : i32
    %c0_i32_0 = arith.constant 0 : i32
    return %arg0, %c0_i32, %arg1 : i32, i32, i32
  }
}

</mosaic_0001>

<bundles_post_ra>
// kernel: tpu_custom_call.1
= control target key start
LH: loop header
LB: loop body
LE: loop exit
PB: predicated region body
PF: predicated region fallthrough
CT: control target
= control target key end

     0   :  { %6 = vsyncpa [#allocation3], 0  ;;  %s616_s0 = inlined_call_operand.hbm [shape: f32[2,8,8], index: 0, kind: input, shape index: {}]   ;;  %s617_s1 = inlined_call_operand.hbm [shape: f32[2,4,8], index: 1, kind: output, shape index: {}]  }
   0x1   :  { %8 = vsyncpa [#allocation3 + $0x1], 0 }
   0x2   :  { %9 = vsyncpa [#allocation4], 0 }
   0x3   :  { %11 = vsyncpa [#allocation4 + $0x1], 0  ;;  %s495_s6 = smov 0   ;;  %s497_s7 = smov 0  }
   0x4   :  { %s499_s8 = smov 0   ;;  %s501_s9 = smov 0  }
   0x5   :  { %s503_s10 = smov 0   ;;  %s505_s11 = smov 0  }
   0x6 LB: > { %s292_s12 = sadd.s32 4294967295, %s483_s11   ;;  %s293_s13 = sadd.s32 4294967294, %s483_s11   ;;  %s483_s11 = sphi %s505_s11, %s17_s11   ;;  %s479_s10 = sphi %s503_s10, %s626_s10   ;;  %s475_s9 = sphi %s501_s9, %s625_s9   ;;  %s471_s8 = sphi %s499_s8, %s624_s8   ;;  %s467_s7 = sphi %s497_s7, %s623_s7   ;;  %s463_s6 = sphi %s495_s6, %s622_s6  }
   0x7   : > { %s29_s14 = sadd.s32 1, %s479_s10  ;;  %s38_s15 = sadd.s32 1, %s471_s8 }
   0x8   : > { %p31_p0 = scmp.ge.s32.totalorder %s29_s14, 2  ;;  %p45_p1 = scmp.ne.s32.totalorder %s471_s8, %s467_s7 }
   0x9   : > { %p46_p2 = scmp.eq.s32.totalorder %s483_s11, 0  ;;  %p51_p3 = scmp.ne.s32.totalorder %s467_s7, %s463_s6 }
   0xa   : > { %s628_s14 = smov (%p31_p0, %s29_s14), 0  ;;  %p52_p5 = scmp.eq.s32.totalorder %s292_s12, 0 }
   0xb   : > { %p536_p4 = por %p46_p2, %p45_p1  ;;  %s33_s17 = ssub.s32 %s479_s10, %s628_s14 }
   0xc   : > { %p77_p6 = scmp.eq.s32.totalorder %s292_s12, 1  ;;  %p36_p7 = scmp.eq.s32.totalorder %s33_s17, 0 }
   0xd   : > { %p542_p8 = por %p52_p5, %p51_p3  ;;  %p83_p10 = scmp.eq.s32.totalorder %s293_s13, 1 }
   0xe   : > { %p546_p9 = por %p77_p6, %p45_p1  ;;  %p295_p12 = scmp.ge.s32.totalorder %s483_s11, 2 }
   0xf   : > { %s551_s20 = scalar_select %p36_p7, %s471_s8, %s38_s15  }
  0x10   : > { %p553_p11 = por %p83_p10, %p51_p3  ;;  %p317_p13 = scmp.lt.s32.totalorder %s483_s11, 2 }
  0x11   : > { %s103_s22 = sand.u32 1, %s471_s8   ;;  %s297_s24 = sshll.u32 %s479_s10, 3 }
  0x12   : > { %s296_s23 = sshll.u32 %s103_s22, 3  ;;  %s112_s27 = scalar_lea.hbm %s616_s0, %s297_s24 }
  0x13   : > { %s107_s28 = scalar_lea.vmem [#allocation2], %s296_s23  ;;  %s114_s30 = sshll.u32 %s112_s27, 4  ;;  %s115_s30 = int_to_ptr.hbm [resolvable:$true] %s114_s30 }
  0x14   : > { %s116_s29 = sshll.u32 %s107_s28, 4  ;;  %p310_p0 = pnand %p317_p13, %p536_p4  ;;  %s117_s29 = int_to_ptr.vmem [resolvable:$true] %s116_s29 }
  0x15   : > { %p298_p1 = scmp.ge.s32.totalorder %s483_s11, 1  ;;  %p121_p2 = scmp.lt.s32.totalorder %s483_s11, 3 }
  0x16   : > { %s104_s2 = scalar_lea.sflag [#allocation3], %s103_s22 }
  0x17   : > { %312 = dma.hbm_to_vmem [thread:$0]  (!%p310_p0), %s115_s30, 128, %s117_s29, %s104_s2  }
  0x18   : > { %p122_p3 = pnand %p298_p1, %p121_p2 }
  0x19   : > { %s569_s3 = sand.u32 (!%p122_p3), 1, %s467_s7  }
  0x1a   : > { %125 = sbr.rel (%p122_p3) target bundleno = 59 (0x3b), region = 24  ;;  %s299_s4 = sshll.u32 (!%p122_p3), %s569_s3, 3 }
  0x1b   : > { %s128_s5 = scalar_lea.sflag (!%p122_p3), [#allocation3], %s569_s3  ;;  %s131_s12 = scalar_lea.vmem (!%p122_p3), [#allocation2], %s299_s4 }
  0x1f   : > { %454 = dma.done.wait (%p542_p8), %s128_s5, 128  }
  0x20   : > { %456 = vsyncadd (%p542_p8), %s128_s5, 4294967168  ;;  %v151_v0 = vld [vmem:[%s131_s12] sm:$0x1]  ;;  %v153_v1 = vld [vmem:[%s131_s12 + $0x2] sm:$0x1]  ;;  %s300_s13 = sshll.u32 %s569_s3, 2 }
  0x21   : > { %v157_v2 = vld [vmem:[%s131_s12 + $0x6] sm:$0x1]  ;;  %v159_v3 = vsub.f32 %v153_v1, %v151_v0  ;;  %v152_v4 = vld [vmem:[%s131_s12 + $0x1] sm:$0x1]  ;;  %v154_v5 = vld [vmem:[%s131_s12 + $0x3] sm:$0x1] }
  0x22   : > { %v167_v6 = vmul.f32 1.442695, %v157_v2  ;;  %v158_v7 = vld [vmem:[%s131_s12 + $0x7] sm:$0x1]  ;;  %v161_v8 = vsub.f32 %v154_v5, %v152_v4  ;;  %v155_v11 = vld [vmem:[%s131_s12 + $0x4] sm:$0x1] }
  0x23   : > { %v163_v9 = vmul.f32 0.5, %v159_v3  ;;  %v170_v10 = vmul.f32 1.442695, %v158_v7  ;;  %v156_v13 = vld [vmem:[%s131_s12 + $0x5] sm:$0x1]  ;;  %v173_v15 = vmul.f32 %v159_v3, %v155_v11  ;;  %s302_s15 = sshll.u32 %s475_s9, 2 }
  0x24   : > { %367 = vpow2.f32 %v167_v6  ;;  %v165_v12 = vmul.f32 0.5, %v161_v8  ;;  %v175_v17 = vmul.f32 %v161_v8, %v156_v13  ;;  %s207_s18 = scalar_lea.hbm %s617_s1, %s302_s15  ;;  %s150_s22 = scalar_lea.vmem [#allocation5], %s300_s13 }
  0x25   : > { %369 = vpow2.f32 %v170_v10  ;;  %v164_v14 = vadd.f32 %v163_v9, %v151_v0  ;;  %s209_s23 = sshll.u32 %s150_s22, 4  ;;  %s211_s9 = sshll.u32 %s207_s18, 4  ;;  %s210_s23 = int_to_ptr.vmem [resolvable:$true] %s209_s23  ;;  %s212_s9 = int_to_ptr.hbm [resolvable:$true] %s211_s9 }
  0x26   : > { %v166_v16 = vadd.f32 %v165_v12, %v152_v4  ;;  %s196_s24 = scalar_lea.sflag [#allocation4], %s569_s3  ;;  %s415_s25 = sshra.s32 %s212_s9, 4  ;;  %s416_s25 = int_to_ptr.hbm [resolvable:$true] %s415_s25 }
  0x27   : > { %v174_v21 = vadd.f32 %v173_v15, %v164_v14  ;;  %s417_s26 = scalar_lea.hbm %s416_s25, 4  ;;  %s421_s29 = scalar_lea.hbm %s617_s1, 8 }
  0x28   : > { %v176_v23 = vadd.f32 %v175_v17, %v166_v16  ;;  %p418_p4 = scmp.ne.s32.totalorder %s416_s25, %s417_s26  ;;  %p422_p7 = scmp.lt.s32.totalorder %s416_s25, %s617_s1 }
  0x29   : > { %p423_p8 = scmp.lt.s32.totalorder %s421_s29, %s417_s26 }
  0x2a   : > { %v368_v18 = vpop.eup %367  ;;  %p419_p5 = pnand %p418_p4, %p546_p9 }
  0x2b   : > { %v370_v19 = vpop.eup %369  ;;  %v169_v20 = vmul.f32 %v368_v18, %v159_v3  ;;  %p424_p10 = por %p423_p8, %p422_p7 }
  0x2c   : > { %v172_v22 = vmul.f32 %v370_v19, %v161_v8  ;;  %p420_p6 = pneg %p419_p5 }
  0x2d   : > { %v177_v24 = vmul.f32 0.5, %v169_v20 }
  0x2e   : > { %v179_v25 = vmul.f32 0.5, %v172_v22  ;;  %p425_p13 = pnand %p424_p10, %p420_p6 }
  0x2f   : > { %v178_v26 = vsub.f32 %v174_v21, %v177_v24  ;;  %v181_v27 = vadd.f32 %v177_v24, %v174_v21 }
  0x30   : > { %v180_v28 = vsub.f32 %v176_v23, %v179_v25  ;;  %v182_v29 = vadd.f32 %v179_v25, %v176_v23 }
  0x31   : > { %v183_v30 = vmax.f32 %v178_v26, 0.0  ;;  %v185_v31 = vmax.f32 %v181_v27, 0.0 }
  0x32   : > { %v187_v32 = vmax.f32 %v180_v28, 0.0  ;;  %v189_v33 = vmax.f32 %v182_v29, 0.0 }
  0x33   : > { %v184_v34 = vmin.f32 %v183_v30, 64.0  ;;  %v186_v35 = vmin.f32 %v185_v31, 64.0 }
  0x34   : > { %v188_v36 = vmin.f32 %v187_v32, 64.0  ;;  %v190_v37 = vmin.f32 %v189_v33, 64.0 }
  0x35   : > { %191 = vst [vmem:[%s150_s22] sm:$0x1] %v184_v34 }
  0x36   : > { %192 = vst [vmem:[%s150_s22 + $0x1] sm:$0x1] %v188_v36 }
  0x37   : > { %193 = vst [vmem:[%s150_s22 + $0x2] sm:$0x1] %v186_v35 }
  0x38   : > { %194 = vst [vmem:[%s150_s22 + $0x3] sm:$0x1] %v190_v37 }
  0x39   : > { %428 = shalt.err (!%p425_p13)
}
  0x3a   : > { %307 = dma.vmem_to_hbm [thread:$0]  (%p546_p9), %s210_s23, 64, %s212_s9, %s196_s24  }
  0x3b PF: > { %s223_s3 = sand.u32 1, %s463_s6   ;;  %p314_p0 = pnand %p295_p12, %p553_p11 }
  0x3c   : > { %s224_s4 = scalar_lea.sflag [#allocation4], %s223_s3 }
  0x3d   : > { %p315_p1 = pneg %p314_p0 }
  0x3f   : > { %458 = dma.done.wait (%p315_p1), %s224_s4, 64  }
  0x40   : > { %460 = vsyncadd (%p315_p1), %s224_s4, 4294967232  ;;  %s17_s11 = sadd.s32 1, %s483_s11   ;;  %s622_s6 = smov %s467_s7 }
  0x41   : > { %p14_p2 = scmp.ge.s32.totalorder %s17_s11, 4   ;;  %s623_s7 = smov %s471_s8 }
  0x42   : > { %s624_s8 = smov %s551_s20  ;;  %s625_s9 = smov %s479_s10 }
  0x43   : > { %s626_s10 = smov %s628_s14  ;;  %16 = sbr.rel (!%p14_p2) target bundleno = 6 (0x6), region = 69 }
  0x48   :  { %230 = vsyncpa [#allocation3], 1 }
  0x49   :  { %232 = vsyncpa [#allocation3 + $0x1], 1 }
  0x4a   :  { %233 = vsyncpa [#allocation4], 1 }
  0x4b   :  { %235 = vsyncpa [#allocation4 + $0x1], 1 }

</bundles_post_ra>
